<compile_context>
chip_gen: v7x
topology: tpu7x:2x2x1
jax: 0.10.0
libtpu: 0.0.40
codegen_flags: <defaults>
</compile_context>

<pallas_src>
import functools

import jax
import jax.numpy as jnp
from jax.experimental import pallas as pl
from jax.experimental.pallas import tpu as pltpu


def _round_up(x, m):
    return (x + m - 1) // m * m


def _dense_conv_relu_kernel(x_ref, w_ref, b_ref, o_ref, *,
                            KH, KW, Wp, S_pad, Cin, Cout, Cout_p, pad_h, pad_w):
    # x_ref: (1, Cin_p, Lpad)        row-flattened, zero-tail-padded reflect-padded image
    # w_ref: (KH*KW, Cout_p, Cin_p)  one (Cout_p, Cin_p) weight matrix per tap
    # b_ref: (Cout_p, 1)             bias (f32)
    # o_ref: (1, Cin+Cout, S_pad)    channel-major output, S_pad = round_up(Ho*Wp, 128)
    xall = x_ref[0]                                        # (Cin_p, Lpad), loaded once

    acc = jnp.zeros((Cout_p, S_pad), jnp.float32)
    x_pass = None
    for kh in range(KH):
        for kw in range(KW):
            off = kh * Wp + kw
            xs = xall[:, off:off + S_pad]                  # (Cin_p, S_pad) static lane shift
            if kh == pad_h and kw == pad_w:
                x_pass = xs                                # centre tap == the un-padded input
            # Per-tap MXU matmul, accumulated in f32 (no im2col lane concat).
            acc = acc + jnp.dot(w_ref[kh * KW + kw], xs,
                                preferred_element_type=jnp.float32)

    acc = jnp.maximum(acc + b_ref[...], 0.0)               # bias + ReLU on f32 accumulator

    # Dense connection fused into the output: two disjoint sublane-range stores,
    # no concatenate, stores are lane-dense (last dim = S_pad, a multiple of 128).
    o_ref[0, 0:Cin, :] = x_pass[0:Cin, :].astype(o_ref.dtype)
    o_ref[0, Cin:Cin + Cout, :] = acc[0:Cout, :].astype(o_ref.dtype)


def dense_conv2d(x_nchw, w_oihw, b, *, stride=1):
    """DenseConv2d.forward: cat([x, relu(conv2d_reflect(x))], dim=1). NCHW in/out."""
    N, Cin, H, W = x_nchw.shape
    Cout, Cin_w, KH, KW = w_oihw.shape
    assert Cin_w == Cin, (Cin_w, Cin)

    pad_h, pad_w = KH // 2, KW // 2
    assert pad_h < H and pad_w < W, "reflect padding requires pad < spatial extent"

    Hp, Wp = H + 2 * pad_h, W + 2 * pad_w
    Ho = (Hp - KH) // stride + 1
    Wo = (Wp - KW) // stride + 1
    # The channel concat in DenseConv2d requires matching spatial dims (odd K, stride 1).
    assert stride == 1 and (Ho, Wo) == (H, W), "DenseConv2d needs stride=1 and odd kernel"
    # TODO(synk): standalone ConvLayer with stride>1 / is_last=True (no ReLU, no concat)
    # is not covered here; DenseConv2d's concat is only defined for stride=1.

    CC = Cin + Cout
    Cin_p = _round_up(Cin, 8)            # f32 sublane tile
    Cout_p = _round_up(Cout, 8)
    S = Ho * Wp                          # conv evaluated at all padded-width columns
    S_pad = _round_up(S, 128)            # lane-dense output / matmul N dim
    Lpad = (KH - 1) * Wp + (KW - 1) + S_pad   # every tap slice stays in bounds

    # NCHW-native wrapper: reflect pad, flatten rows, zero-pad channels and flat tail.
    x_pad = jnp.pad(x_nchw, ((0, 0), (0, 0), (pad_h, pad_h), (pad_w, pad_w)), mode="reflect")
    x_flat = x_pad.reshape(N, Cin, Hp * Wp)
    x_flat = jnp.pad(x_flat, ((0, 0), (0, Cin_p - Cin), (0, Lpad - Hp * Wp)))

    # (O, I, KH, KW) -> (KH*KW, Cout_p, Cin_p): one small LHS matrix per tap.
    w_taps = jnp.transpose(w_oihw, (2, 3, 0, 1)).reshape(KH * KW, Cout, Cin)
    w_taps = jnp.pad(w_taps, ((0, 0), (0, Cout_p - Cout), (0, Cin_p - Cin))).astype(jnp.float32)
    b2 = jnp.pad(b.astype(jnp.float32), (0, Cout_p - Cout)).reshape(Cout_p, 1)

    # Explicit VMEM budget: 2x double-buffered input + 2x output block + tap slices + acc.
    itm = 4
    need = (2 * Cin_p * Lpad + 2 * CC * S_pad
            + (KH * KW * Cin_p + 2 * Cout_p) * S_pad) * itm + (1 << 20)
    vmem_limit = int(min(100 * 2**20, max(32 * 2**20, 2 * need)))

    kern = functools.partial(_dense_conv_relu_kernel, KH=KH, KW=KW, Wp=Wp, S_pad=S_pad,
                             Cin=Cin, Cout=Cout, Cout_p=Cout_p, pad_h=pad_h, pad_w=pad_w)

    out_flat = pl.pallas_call(
        kern,
        out_shape=jax.ShapeDtypeStruct((N, CC, S_pad), x_nchw.dtype),
        grid_spec=pltpu.PrefetchScalarGridSpec(
            num_scalar_prefetch=0,
            grid=(N,),
            in_specs=[
                pl.BlockSpec((1, Cin_p, Lpad), lambda n: (n, 0, 0)),
                pl.BlockSpec((KH * KW, Cout_p, Cin_p), lambda n: (0, 0, 0)),
                pl.BlockSpec((Cout_p, 1), lambda n: (0, 0)),
            ],
            out_specs=pl.BlockSpec((1, CC, S_pad), lambda n: (n, 0, 0)),
        ),
        compiler_params=pltpu.CompilerParams(
            dimension_semantics=("parallel",),
            vmem_limit_bytes=vmem_limit),
    )(x_flat, w_taps, b2)

    # Drop padded / garbage columns; output is already channel-major (NCHW), no transpose.
    out = out_flat[:, :, :S].reshape(N, CC, Ho, Wp)[:, :, :, :Wo]
    return out


if __name__ == "__main__":
    key = jax.random.PRNGKey(0)
    k_x, k_w, k_b = jax.random.split(key, 3)

    # Small shapes consistent with the module: NCHW input, kernel 3, stride 1.
    N, Cin, H, W = 2, 4, 16, 16
    Cout, K, stride = 4, 3, 1

    x = jax.random.normal(k_x, (N, Cin, H, W), dtype=jnp.float32)

    # Deterministic init mimicking nn.Conv2d default (uniform in +/- 1/sqrt(fan_in)).
    fan_in = Cin * K * K
    bound = 1.0 / (fan_in ** 0.5)
    w = jax.random.uniform(k_w, (Cout, Cin, K, K), jnp.float32, -bound, bound)
    b = jax.random.uniform(k_b, (Cout,), jnp.float32, -bound, bound)

    out = dense_conv2d(x, w, b, stride=stride)
    out = jax.block_until_ready(out)

    # Reference: reflect-pad then VALID conv + bias + ReLU, concat with input.
    pad = K // 2
    x_pad_ref = jnp.pad(x, ((0, 0), (0, 0), (pad, pad), (pad, pad)), mode="reflect")
    conv_ref = jax.lax.conv_general_dilated(
        x_pad_ref, w, (stride, stride), "VALID",
        dimension_numbers=("NCHW", "OIHW", "NCHW"),
        precision=jax.lax.Precision.HIGHEST,
    )
    ref = jnp.concatenate(
        [x, jnp.maximum(conv_ref + b[None, :, None, None], 0.0)], axis=1
    )

    assert out.shape == (N, Cin + Cout, H, W), out.shape
    # f32 multi-pass MXU matmul vs HIGHEST-precision XLA conv: differences are O(1e-6);
    # tolerance left with margin for pass-decomposition rounding.
    assert jnp.allclose(out, ref, atol=1e-3, rtol=1e-3), float(jnp.max(jnp.abs(out - ref)))
    print("KERNEL_OK")
</pallas_src>

<mosaic_0001>
module attributes {stable_mosaic.version = 11 : i64} {
  func.func @_dense_conv_relu_kernel(%arg0: i32, %arg1: memref<1x8x422xf32, #tpu.memory_space<vmem>>, %arg2: memref<9x8x8xf32, #tpu.memory_space<vmem>>, %arg3: memref<8x1xf32, #tpu.memory_space<vmem>>, %arg4: memref<1x8x384xf32, #tpu.memory_space<vmem>>) attributes {dimension_semantics = [#tpu.dimension_semantics<parallel>], iteration_bounds = array<i64: 2>, scalar_prefetch = 0 : i64, scratch_operands = 0 : i64, tpu.core_type = #tpu.core_type<tc>, window_params = [{transform_indices = @transform_0, window_bounds = array<i64: 1, 8, 422>}, {pipeline_mode = #tpu.pipeline_mode<synchronous>, transform_indices = @transform_1, window_bounds = array<i64: 9, 8, 8>}, {pipeline_mode = #tpu.pipeline_mode<synchronous>, transform_indices = @transform_2, window_bounds = array<i64: 8, 1>}, {transform_indices = @transform_3, window_bounds = array<i64: 1, 8, 384>}]} {
    %c0 = arith.constant 0 : index
    %c0_0 = arith.constant 0 : index
    %c0_1 = arith.constant 0 : index
    %0 = vector.load %arg1[%c0, %c0_0, %c0_1] : memref<1x8x422xf32, #tpu.memory_space<vmem>>, vector<1x8x422xf32>
    %1 = vector.shape_cast %0 : vector<1x8x422xf32> to vector<8x422xf32>
    %cst = arith.constant 0.000000e+00 : f32
    %2 = vector.broadcast %cst : f32 to vector<8x384xf32>
    %3 = vector.extract_strided_slice %1 {offsets = [0, 0], sizes = [8, 384], strides = [1, 1]} : vector<8x422xf32> to vector<8x384xf32>
    %c0_2 = arith.constant 0 : index
    %c0_3 = arith.constant 0 : index
    %c0_4 = arith.constant 0 : index
    %4 = vector.load %arg2[%c0_2, %c0_3, %c0_4] : memref<9x8x8xf32, #tpu.memory_space<vmem>>, vector<1x8x8xf32>
    %5 = vector.shape_cast %4 : vector<1x8x8xf32> to vector<8x8xf32>
    %cst_5 = arith.constant dense<0.000000e+00> : vector<8x384xf32>
    %6 = tpu.matmul %5, %3, %cst_5 {dimension_numbers = #tpu.dot_dimension_numbers<[1], [0], [0], [1], [0, 0, 1, 1], [], []>} : vector<8x8xf32>, vector<8x384xf32>, vector<8x384xf32> -> vector<8x384xf32>
    %7 = arith.addf %2, %6 : vector<8x384xf32>
    %8 = vector.extract_strided_slice %1 {offsets = [0, 1], sizes = [8, 384], strides = [1, 1]} : vector<8x422xf32> to vector<8x384xf32>
    %c1 = arith.constant 1 : index
    %c0_6 = arith.constant 0 : index
    %c0_7 = arith.constant 0 : index
    %9 = vector.load %arg2[%c1, %c0_6, %c0_7] : memref<9x8x8xf32, #tpu.memory_space<vmem>>, vector<1x8x8xf32>
    %10 = vector.shape_cast %9 : vector<1x8x8xf32> to vector<8x8xf32>
    %cst_8 = arith.constant dense<0.000000e+00> : vector<8x384xf32>
    %11 = tpu.matmul %10, %8, %cst_8 {dimension_numbers = #tpu.dot_dimension_numbers<[1], [0], [0], [1], [0, 0, 1, 1], [], []>} : vector<8x8xf32>, vector<8x384xf32>, vector<8x384xf32> -> vector<8x384xf32>
    %12 = arith.addf %7, %11 : vector<8x384xf32>
    %13 = vector.extract_strided_slice %1 {offsets = [0, 2], sizes = [8, 384], strides = [1, 1]} : vector<8x422xf32> to vector<8x384xf32>
    %c2 = arith.constant 2 : index
    %c0_9 = arith.constant 0 : index
    %c0_10 = arith.constant 0 : index
    %14 = vector.load %arg2[%c2, %c0_9, %c0_10] : memref<9x8x8xf32, #tpu.memory_space<vmem>>, vector<1x8x8xf32>
    %15 = vector.shape_cast %14 : vector<1x8x8xf32> to vector<8x8xf32>
    %cst_11 = arith.constant dense<0.000000e+00> : vector<8x384xf32>
    %16 = tpu.matmul %15, %13, %cst_11 {dimension_numbers = #tpu.dot_dimension_numbers<[1], [0], [0], [1], [0, 0, 1, 1], [], []>} : vector<8x8xf32>, vector<8x384xf32>, vector<8x384xf32> -> vector<8x384xf32>
    %17 = arith.addf %12, %16 : vector<8x384xf32>
    %18 = vector.extract_strided_slice %1 {offsets = [0, 18], sizes = [8, 384], strides = [1, 1]} : vector<8x422xf32> to vector<8x384xf32>
    %c3 = arith.constant 3 : index
    %c0_12 = arith.constant 0 : index
    %c0_13 = arith.constant 0 : index
    %19 = vector.load %arg2[%c3, %c0_12, %c0_13] : memref<9x8x8xf32, #tpu.memory_space<vmem>>, vector<1x8x8xf32>
    %20 = vector.shape_cast %19 : vector<1x8x8xf32> to vector<8x8xf32>
    %cst_14 = arith.constant dense<0.000000e+00> : vector<8x384xf32>
    %21 = tpu.matmul %20, %18, %cst_14 {dimension_numbers = #tpu.dot_dimension_numbers<[1], [0], [0], [1], [0, 0, 1, 1], [], []>} : vector<8x8xf32>, vector<8x384xf32>, vector<8x384xf32> -> vector<8x384xf32>
    %22 = arith.addf %17, %21 : vector<8x384xf32>
    %23 = vector.extract_strided_slice %1 {offsets = [0, 19], sizes = [8, 384], strides = [1, 1]} : vector<8x422xf32> to vector<8x384xf32>
    %c4 = arith.constant 4 : index
    %c0_15 = arith.constant 0 : index
    %c0_16 = arith.constant 0 : index
    %24 = vector.load %arg2[%c4, %c0_15, %c0_16] : memref<9x8x8xf32, #tpu.memory_space<vmem>>, vector<1x8x8xf32>
    %25 = vector.shape_cast %24 : vector<1x8x8xf32> to vector<8x8xf32>
    %cst_17 = arith.constant dense<0.000000e+00> : vector<8x384xf32>
    %26 = tpu.matmul %25, %23, %cst_17 {dimension_numbers = #tpu.dot_dimension_numbers<[1], [0], [0], [1], [0, 0, 1, 1], [], []>} : vector<8x8xf32>, vector<8x384xf32>, vector<8x384xf32> -> vector<8x384xf32>
    %27 = arith.addf %22, %26 : vector<8x384xf32>
    %28 = vector.extract_strided_slice %1 {offsets = [0, 20], sizes = [8, 384], strides = [1, 1]} : vector<8x422xf32> to vector<8x384xf32>
    %c5 = arith.constant 5 : index
    %c0_18 = arith.constant 0 : index
    %c0_19 = arith.constant 0 : index
    %29 = vector.load %arg2[%c5, %c0_18, %c0_19] : memref<9x8x8xf32, #tpu.memory_space<vmem>>, vector<1x8x8xf32>
    %30 = vector.shape_cast %29 : vector<1x8x8xf32> to vector<8x8xf32>
    %cst_20 = arith.constant dense<0.000000e+00> : vector<8x384xf32>
    %31 = tpu.matmul %30, %28, %cst_20 {dimension_numbers = #tpu.dot_dimension_numbers<[1], [0], [0], [1], [0, 0, 1, 1], [], []>} : vector<8x8xf32>, vector<8x384xf32>, vector<8x384xf32> -> vector<8x384xf32>
    %32 = arith.addf %27, %31 : vector<8x384xf32>
    %33 = vector.extract_strided_slice %1 {offsets = [0, 36], sizes = [8, 384], strides = [1, 1]} : vector<8x422xf32> to vector<8x384xf32>
    %c6 = arith.constant 6 : index
    %c0_21 = arith.constant 0 : index
    %c0_22 = arith.constant 0 : index
    %34 = vector.load %arg2[%c6, %c0_21, %c0_22] : memref<9x8x8xf32, #tpu.memory_space<vmem>>, vector<1x8x8xf32>
    %35 = vector.shape_cast %34 : vector<1x8x8xf32> to vector<8x8xf32>
    %cst_23 = arith.constant dense<0.000000e+00> : vector<8x384xf32>
    %36 = tpu.matmul %35, %33, %cst_23 {dimension_numbers = #tpu.dot_dimension_numbers<[1], [0], [0], [1], [0, 0, 1, 1], [], []>} : vector<8x8xf32>, vector<8x384xf32>, vector<8x384xf32> -> vector<8x384xf32>
    %37 = arith.addf %32, %36 : vector<8x384xf32>
    %38 = vector.extract_strided_slice %1 {offsets = [0, 37], sizes = [8, 384], strides = [1, 1]} : vector<8x422xf32> to vector<8x384xf32>
    %c7 = arith.constant 7 : index
    %c0_24 = arith.constant 0 : index
    %c0_25 = arith.constant 0 : index
    %39 = vector.load %arg2[%c7, %c0_24, %c0_25] : memref<9x8x8xf32, #tpu.memory_space<vmem>>, vector<1x8x8xf32>
    %40 = vector.shape_cast %39 : vector<1x8x8xf32> to vector<8x8xf32>
    %cst_26 = arith.constant dense<0.000000e+00> : vector<8x384xf32>
    %41 = tpu.matmul %40, %38, %cst_26 {dimension_numbers = #tpu.dot_dimension_numbers<[1], [0], [0], [1], [0, 0, 1, 1], [], []>} : vector<8x8xf32>, vector<8x384xf32>, vector<8x384xf32> -> vector<8x384xf32>
    %42 = arith.addf %37, %41 : vector<8x384xf32>
    %43 = vector.extract_strided_slice %1 {offsets = [0, 38], sizes = [8, 384], strides = [1, 1]} : vector<8x422xf32> to vector<8x384xf32>
    %c8 = arith.constant 8 : index
    %c0_27 = arith.constant 0 : index
    %c0_28 = arith.constant 0 : index
    %44 = vector.load %arg2[%c8, %c0_27, %c0_28] : memref<9x8x8xf32, #tpu.memory_space<vmem>>, vector<1x8x8xf32>
    %45 = vector.shape_cast %44 : vector<1x8x8xf32> to vector<8x8xf32>
    %cst_29 = arith.constant dense<0.000000e+00> : vector<8x384xf32>
    %46 = tpu.matmul %45, %43, %cst_29 {dimension_numbers = #tpu.dot_dimension_numbers<[1], [0], [0], [1], [0, 0, 1, 1], [], []>} : vector<8x8xf32>, vector<8x384xf32>, vector<8x384xf32> -> vector<8x384xf32>
    %47 = arith.addf %42, %46 : vector<8x384xf32>
    %c0_30 = arith.constant 0 : index
    %c0_31 = arith.constant 0 : index
    %48 = vector.load %arg3[%c0_30, %c0_31] : memref<8x1xf32, #tpu.memory_space<vmem>>, vector<8x1xf32>
    %49 = vector.broadcast %48 : vector<8x1xf32> to vector<8x384xf32>
    %50 = arith.addf %47, %49 : vector<8x384xf32>
    %cst_32 = arith.constant 0.000000e+00 : f32
    %51 = vector.broadcast %cst_32 : f32 to vector<8x384xf32>
    %52 = arith.maximumf %50, %51 : vector<8x384xf32>
    %53 = vector.extract_strided_slice %23 {offsets = [0, 0], sizes = [4, 384], strides = [1, 1]} : vector<8x384xf32> to vector<4x384xf32>
    %c0_33 = arith.constant 0 : index
    %c0_34 = arith.constant 0 : index
    %c0_35 = arith.constant 0 : index
    %54 = vector.load %arg4[%c0_33, %c0_34, %c0_35] : memref<1x8x384xf32, #tpu.memory_space<vmem>>, vector<1x4x384xf32>
    %55 = vector.shape_cast %54 : vector<1x4x384xf32> to vector<4x384xf32>
    %56 = vector.shape_cast %53 : vector<4x384xf32> to vector<1x4x384xf32>
    tpu.vector_store %arg4[%c0_33, %c0_34, %c0_35], %56 {strides = array<i32>} : memref<1x8x384xf32, #tpu.memory_space<vmem>>, vector<1x4x384xf32>,
    %57 = vector.extract_strided_slice %52 {offsets = [0, 0], sizes = [4, 384], strides = [1, 1]} : vector<8x384xf32> to vector<4x384xf32>
    %c0_36 = arith.constant 0 : index
    %c4_37 = arith.constant 4 : index
    %c0_38 = arith.constant 0 : index
    %58 = vector.load %arg4[%c0_36, %c4_37, %c0_38] : memref<1x8x384xf32, #tpu.memory_space<vmem>>, vector<1x4x384xf32>
    %59 = vector.shape_cast %58 : vector<1x4x384xf32> to vector<4x384xf32>
    %60 = vector.shape_cast %57 : vector<4x384xf32> to vector<1x4x384xf32>
    tpu.vector_store %arg4[%c0_36, %c4_37, %c0_38], %60 {strides = array<i32>} : memref<1x8x384xf32, #tpu.memory_space<vmem>>, vector<1x4x384xf32>,
    return
  }
  func.func @transform_0(%arg0: i32) -> (i32, i32, i32) {
    %c0_i32 = arith.constant 0 : i32
    %c0_i32_0 = arith.constant 0 : i32
    %c0_i32_1 = arith.constant 0 : i32
    return %arg0, %c0_i32, %c0_i32_0 : i32, i32, i32
  }
  func.func @transform_1(%arg0: i32) -> (i32, i32, i32) {
    %c0_i32 = arith.constant 0 : i32
    %c0_i32_0 = arith.constant 0 : i32
    %c0_i32_1 = arith.constant 0 : i32
    %c0_i32_2 = arith.constant 0 : i32
    return %c0_i32, %c0_i32_0, %c0_i32_1 : i32, i32, i32
  }
  func.func @transform_2(%arg0: i32) -> (i32, i32) {
    %c0_i32 = arith.constant 0 : i32
    %c0_i32_0 = arith.constant 0 : i32
    %c0_i32_1 = arith.constant 0 : i32
    return %c0_i32, %c0_i32_0 : i32, i32
  }
  func.func @transform_3(%arg0: i32) -> (i32, i32, i32) {
    %c0_i32 = arith.constant 0 : i32
    %c0_i32_0 = arith.constant 0 : i32
    %c0_i32_1 = arith.constant 0 : i32
    return %arg0, %c0_i32, %c0_i32_0 : i32, i32, i32
  }
}

</mosaic_0001>

<bundles_post_ra>
// kernel: tpu_custom_call.1
= control target key start
LH: loop header
LB: loop body
LE: loop exit
PB: predicated region body
PF: predicated region fallthrough
CT: control target
= control target key end

     0   :  { %8 = vsyncpa [#allocation3], 0  ;;  %s2245_s0 = inlined_call_operand.vmem [shape: f32[2,8,422], index: 0, kind: input, shape index: {}]   ;;  %s2246_s1 = inlined_call_operand.vmem [shape: f32[9,8,8], index: 1, kind: input, shape index: {}]   ;;  %s2247_s2 = inlined_call_operand.vmem [shape: f32[8,1], index: 2, kind: input, shape index: {}]   ;;  %s2248_s3 = inlined_call_operand.hbm [shape: f32[2,8,384], index: 3, kind: output, shape index: {}]  }
   0x1   :  { %10 = vsyncpa [#allocation3 + $0x1], 0  ;;  %s1997_s12 = smov 0   ;;  %s1999_s13 = smov 0  }
   0x2   :  { %s2001_s14 = smov 0   ;;  %s2003_s15 = smov 0  }
   0x3 LB: > { %s2018_s16 = sadd.s32 4294967295, %s1963_s15   ;;  %s1733_s17 = sadd.s32 4294967294, %s1963_s15   ;;  %s1963_s15 = sphi %s2003_s15, %s2254_s15   ;;  %s1959_s14 = sphi %s2001_s14, %s2253_s14   ;;  %s1955_s13 = sphi %s1999_s13, %s2252_s13   ;;  %s1951_s12 = sphi %s1997_s12, %s2251_s12  }
   0x4   : > { %s2022_s18 = sadd.s32 1, %s1963_s15   ;;  %s91_s19 = sadd.s32 1, %s1959_s14 }
   0x5   : > { %s88_s20 = ssub.s32 %s1963_s15, %s2022_s18  ;;  %p101_p0 = scmp.ne.s32.totalorder %s1959_s14, %s1955_s13 }
   0x6   : > { %p89_p1 = scmp.eq.s32.totalorder %s88_s20, 0  ;;  %p102_p2 = scmp.eq.s32.totalorder %s2018_s16, 1 }
   0x7   : > { %p107_p3 = scmp.ne.s32.totalorder %s1955_s13, %s1951_s12  ;;  %p108_p4 = scmp.eq.s32.totalorder %s1733_s17, 1 }
   0x8   : > { %s2033_s21 = scalar_select %p89_p1, %s1959_s14, %s91_s19  }
   0x9   : > { %p2035_p5 = por %p102_p2, %p101_p0  ;;  %p2039_p6 = por %p108_p4, %p107_p3 }
   0xa   : > { %p1736_p7 = scmp.ge.s32.totalorder %s1963_s15, 1  ;;  %p140_p8 = scmp.lt.s32.totalorder %s1963_s15, 3 }
   0xc   : > { %p141_p9 = pnand %p1736_p7, %p140_p8 }
   0xd   : > { %p164_p10 = scmp.lt.s32.totalorder (!%p141_p9), %s2018_s16, 1  ;;  %v1965_v0 = vmov (!%p141_p9), 0.0   ;;  %s1966_s29 = smov (!%p141_p9), 127   ;;  %vm1968_vm0 = vmmov (!%p141_p9), 0   ;;  %v1975_v5 = vmov (!%p141_p9), 0   ;;  %v1632_v6 = vld [vmem:[%s2247_s2] sm:$0xff] (!%p141_p9) }
   0xe   : > { %144 = sbr.rel (%p141_p9) target bundleno = 445 (0x1bd), region = 32  ;;  %263 = vmatprep.mubr.f32.mxu0 (!%p141_p9), %v1965_v0  ;;  %1787 = vmatprep.subr.mxu1 (!%p141_p9), %v1965_v0  ;;  %s1967_s30 = smov (!%p141_p9), 126   ;;  %vm188_vm1 = vcmask (!%p141_p9), 1039360   ;;  %v1739_v12 = vld [vmem:[%s2246_s1 + $0x8] sm:$0xff] (!%p141_p9)  ;;  %vm195_vm2 = vcmask (!%p141_p9), 64512   ;;  %vm494_vm3 = vcmask (!%p141_p9), 1031168  }
   0xf   : > { %1789 = vmatprep.mubr.msk.f32.mxu1 (!%p141_p9), %vm1968_vm0, %v1965_v0  ;;  %s1969_s4 = smov (!%p141_p9), 110   ;;  %s1970_s5 = smov (!%p141_p9), 109   ;;  %1900 = vset.pattern.permute.xlu0 (!%p141_p9), %v1975_v5  ;;  %vm658_vm4 = vcmask (!%p141_p9), 900096   ;;  %v173_v19 = vld [vmem:[%s2246_s1] sm:$0xff] (!%p141_p9)  ;;  %vm822_vm5 = vcmask (!%p141_p9), 891904   ;;  %v1744_v27 = vld [vmem:[%s2246_s1 + $0x10] sm:$0xff] (!%p141_p9) }
  0x10   : > { %s1971_s6 = smov (!%p141_p9), 108   ;;  %s1972_s7 = smov (!%p141_p9), 92   ;;  %vm986_vm6 = vcmask (!%p141_p9), 883712   ;;  %v1747_v36 = vld [vmem:[%s2246_s1 + $0x18] sm:$0xff] (!%p141_p9)  ;;  %v1750_v44 = vld [vmem:[%s2246_s1 + $0x20] sm:$0xff] (!%p141_p9)  ;;  %vm1150_vm7 = vcmask (!%p141_p9), 752640  }
  0x11   : > { %s1973_s8 = smov (!%p141_p9), 91   ;;  %s1974_s9 = smov (!%p141_p9), 90   ;;  %v1753_v51 = vld [vmem:[%s2246_s1 + $0x28] sm:$0xff] (!%p141_p9)  ;;  %v1756_v57 = vld [vmem:[%s2246_s1 + $0x30] sm:$0xff] (!%p141_p9)  ;;  %vm1314_vm8 = vcmask (!%p141_p9), 744448   ;;  %v1759_v61 = vld [vmem:[%s2246_s1 + $0x38] sm:$0xff] (!%p141_p9) }
  0x12   : > { %s161_s20 = sand.u32 (!%p141_p9), 1, %s1955_s13   ;;  %vm1478_vm9 = vcmask (!%p141_p9), 736256  }
  0x13   : > { %s1848_s26 = smul.u32 (!%p141_p9), 24, %s161_s20 }
  0x15   : > { %s165_s24 = scalar_select %p164_p10, %s2018_s16, 1 }
  0x17   : > { %s1768_s25 = sshll.u32 %s165_s24, 5 }
  0x18   : > { %s168_s28 = scalar_lea.vmem %s2245_s0, %s1768_s25  ;;  %s1849_s25 = smul.u32 384, %s2018_s16 }
  0x19   : > { %v2052_v1 = vld [vmem:[%s168_s28 + $0x8] sm:$0xff]  ;;  %v2054_v2 = vld [vmem:[%s168_s28] sm:$0xff]  ;;  %v2058_v3 = vld [vmem:[%s168_s28 + $0x10] sm:$0xff] }
  0x1a   : > { %182 = vrot.lane.b32.xlu0 %v2052_v1, %s1966_s29  ;;  %180 = vrot.lane.b32.xlu1 %v2054_v2, %s1966_s29  ;;  %v172_v4 = vld [vmem:[%s168_s28 + $0x18] sm:$0xff] }
  0x1e   : > { %184 = vrot.lane.b32.xlu0 %v2058_v3, %s1966_s29  ;;  %488 = vrot.lane.b32.xlu1 %v2052_v1, %s1967_s30 }
  0x22   : > { %490 = vrot.lane.b32.xlu0 %v2058_v3, %s1967_s30  ;;  %486 = vrot.lane.b32.xlu1 %v2054_v2, %s1967_s30 }
  0x26   : > { %652 = vrot.lane.b32.xlu0 %v2052_v1, %s1969_s4  ;;  %654 = vrot.lane.b32.xlu1 %v2058_v3, %s1969_s4 }
  0x2a   : > { %650 = vrot.lane.b32.xlu0 %v2054_v2, %s1969_s4  ;;  %186 = vrot.lane.b32.xlu1 %v172_v4, %s1966_s29  ;;  %s2118_s29 = scalar_lea.vmem [#allocation2], %s1848_s26 }
  0x2b   : > { %s1674_s26 = sshll.u32 %s2118_s29, 4  ;;  %s2201_s26 = int_to_ptr.vmem [resolvable:$true] %s1674_s26 }
  0x2c   : > { %s1901_s16 = scalar_lea.vmem %s2201_s26, 384 }
  0x2d   : > { %p1902_p11 = scmp.ne.s32.totalorder %s2201_s26, %s1901_s16 }
  0x2e   : > { %816 = vrot.lane.b32.xlu0 %v2052_v1, %s1970_s5  ;;  %818 = vrot.lane.b32.xlu1 %v2058_v3, %s1970_s5 }
  0x2f   : > { %p1903_p12 = pnand %p1902_p11, %p2035_p5 }
  0x31   : > { %p1904_p13 = pneg %p1903_p12 }
  0x32   : > { %814 = vrot.lane.b32.xlu0 %v2054_v2, %s1970_s5  ;;  %492 = vrot.lane.b32.xlu1 %v172_v4, %s1967_s30  ;;  %s2199_s30 = scalar_lea.hbm %s2248_s3, %s1849_s25 }
  0x36   : > { %980 = vrot.lane.b32.xlu0 %v2052_v1, %s1971_s6  ;;  %982 = vrot.lane.b32.xlu1 %v2058_v3, %s1971_s6 }
  0x3a   : > { %978 = vrot.lane.b32.xlu0 %v2054_v2, %s1971_s6  ;;  %656 = vrot.lane.b32.xlu1 %v172_v4, %s1969_s4  ;;  %s1660_s4 = scalar_lea.sflag [#allocation3], %s161_s20 }
  0x3e   : > { %820 = vrot.lane.b32.xlu0 %v172_v4, %s1970_s5  ;;  %1144 = vrot.lane.b32.xlu1 %v2052_v1, %s1972_s7  ;;  %s1976_s5 = smov [#allocation2]  }
  0x42   : > { %1146 = vrot.lane.b32.xlu0 %v2058_v3, %s1972_s7  ;;  %1142 = vrot.lane.b32.xlu1 %v2054_v2, %s1972_s7 }
  0x46   : > { %984 = vrot.lane.b32.xlu0 %v172_v4, %s1971_s6  ;;  %1148 = vrot.lane.b32.xlu1 %v172_v4, %s1972_s7  ;;  %s1905_s6 = sshll.u32 %s1976_s5, 4  ;;  %s1906_s6 = int_to_ptr.vmem [resolvable:$false] %s1905_s6 }
  0x47   : > { %s1907_s7 = scalar_lea.vmem %s1906_s6, 768  ;;  %p1908_p0 = scmp.lt.s32.totalorder %s2201_s26, %s1906_s6 }
  0x48   : > { %p1909_p1 = scmp.lt.s32.totalorder %s1907_s7, %s1901_s16 }
  0x4a   : > { %1308 = vrot.lane.b32.xlu0 %v2052_v1, %s1973_s8  ;;  %1310 = vrot.lane.b32.xlu1 %v2058_v3, %s1973_s8  ;;  %p1910_p2 = por %p1909_p1, %p1908_p0 }
  0x4c   : > { %p1911_p3 = pnand %p1910_p2, %p1904_p13 }
  0x4e   : > { %1306 = vrot.lane.b32.xlu0 %v2054_v2, %s1973_s8  ;;  %1312 = vrot.lane.b32.xlu1 %v172_v4, %s1973_s8 }
  0x52   : > { %1472 = vrot.lane.b32.xlu0 %v2052_v1, %s1974_s9  ;;  %1474 = vrot.lane.b32.xlu1 %v2058_v3, %s1974_s9 }
  0x56   : > { %1476 = vrot.lane.b32.xlu0 %v172_v4, %s1974_s9  ;;  %1470 = vrot.lane.b32.xlu1 %v2054_v2, %s1974_s9 }
  0x5a   : > { %1635 = vperm.xlu0 %1900, %v1632_v6   ;;  %v1762_v6 = vld [vmem:[%s2246_s1 + $0x40] sm:$0xff] }
  0x8c   : > { %v183_v7 = vpop.permute.xlu0 %182  ;;  %v181_v8 = vpop.permute.xlu1 %180 }
  0x8d   : > { %v189_v13 = vsel %vm188_vm1, %v181_v8, %v183_v7 }
  0x90   : > { %v185_v9 = vpop.permute.xlu0 %184  ;;  %v489_v10 = vpop.permute.xlu1 %488 }
  0x91   : > { %v190_v11 = vsel %vm188_vm1, %v183_v7, %v185_v9 }
  0x92   : > { %199 = vmatprep.subr.mxu0 %v190_v11 }
  0x93   : > { %200 = vmatpush1.msra.mxu0 %v189_v13 }
  0x94   : > { %v491_v14 = vpop.permute.xlu0 %490  ;;  %1740 = vmatmul.mubr.msk.f32.vlgmr.msra.gmra.mrb[0].mxu0 %vm195_vm2, %v1739_v12  ;;  %343 = vmatprep.subr.mxu0 %v2052_v1  ;;  %v487_v15 = vpop.permute.xlu1 %486 }
  0x95   : > { %344 = vmatpush1.msra.mxu0 %v2054_v2  ;;  %v496_v16 = vsel %vm494_vm3, %v489_v10, %v491_v14  ;;  %407 = vmatprep.mubr.f32.mxu0 %v1965_v0  ;;  %v495_v20 = vsel %vm494_vm3, %v487_v15, %v489_v10 }
  0x96   : > { %504 = vmatprep.subr.mxu0 %v496_v16 }
  0x98   : > { %v653_v17 = vpop.permute.xlu0 %652  ;;  %v655_v18 = vpop.permute.xlu1 %654 }
  0x99   : > { %v660_v21 = vsel %vm658_vm4, %v653_v17, %v655_v18 }
  0x9c   : > { %v651_v22 = vpop.permute.xlu0 %650  ;;  %1742 = vmatmul.mubr.msk.f32.vlgmr.msra.gmra.mrb[0].mxu0 %vm195_vm2, %v173_v19  ;;  %v187_v23 = vpop.permute.xlu1 %186 }
  0x9d   : > { %505 = vmatpush1.msra.mxu0 %v495_v20  ;;  %v191_v24 = vsel %vm188_vm1, %v185_v9, %v187_v23  ;;  %568 = vmatprep.mubr.f32.mxu0 %v1965_v0  ;;  %v659_v29 = vsel %vm658_vm4, %v651_v22, %v653_v17 }
  0x9e   : > { %668 = vmatprep.subr.mxu0 %v660_v21  ;;  %1788 = vmatpush3.msra.mxu1 %v191_v24 }
  0x9f   : > { %1790 = vmatmul.mubr.msk.f32.vlgmr.msra.gmra.mrb[0].mxu1 %vm195_vm2, %v1739_v12  ;;  %1792 = vmatprep.subr.mxu1 %v1965_v0 }
  0xa0   : > { %v817_v25 = vpop.permute.xlu0 %816  ;;  %v819_v26 = vpop.permute.xlu1 %818  ;;  %1793 = vmatpush3.msra.mxu1 %v2058_v3  ;;  %1794 = vmatprep.mubr.msk.f32.mxu1 %vm1968_vm0, %v1965_v0 }
  0xa1   : > { %1797 = vmatprep.subr.mxu1 %v1965_v0  ;;  %v824_v28 = vsel %vm822_vm5, %v817_v25, %v819_v26 }
  0xa2   : > { %1645 = vst [vmem:[%s2118_s29 + $0x8] sm:$0xf] %v824_v28 }
  0xa3   : > { %1795 = vmatmul.mubr.msk.f32.vlgmr.msra.gmra.mrb[2].mxu1 %vm195_vm2, %v173_v19 }
  0xa4   : > { %v815_v30 = vpop.permute.xlu0 %814  ;;  %1745 = vmatmul.mubr.msk.f32.vlgmr.msra.gmra.mrb[0].mxu0 %vm195_vm2, %v1744_v27  ;;  %v493_v31 = vpop.permute.xlu1 %492  ;;  %1799 = vmatprep.mubr.msk.f32.mxu1 %vm1968_vm0, %v1965_v0 }
  0xa5   : > { %v823_v32 = vsel %vm822_vm5, %v815_v30, %v817_v25  ;;  %669 = vmatpush1.msra.mxu0 %v659_v29  ;;  %v497_v33 = vsel %vm494_vm3, %v491_v14, %v493_v31  ;;  %732 = vmatprep.mubr.f32.mxu0 %v1965_v0 }
  0xa6   : > { %1644 = vst [vmem:[%s2118_s29] sm:$0xf] %v823_v32  ;;  %832 = vmatprep.subr.mxu0 %v824_v28  ;;  %1798 = vmatpush3.msra.mxu1 %v497_v33 }
  0xa7   : > { %1802 = vmatprep.subr.mxu1 %v1965_v0  ;;  %1800 = vmatmul.mubr.msk.f32.vlgmr.msra.gmra.mrb[4].mxu1 %vm195_vm2, %v1744_v27 }
  0xa8   : > { %v981_v34 = vpop.permute.xlu0 %980  ;;  %v983_v35 = vpop.permute.xlu1 %982  ;;  %1804 = vmatprep.mubr.msk.f32.mxu1 %vm1968_vm0, %v1965_v0 }
  0xa9   : > { %v988_v37 = vsel %vm986_vm6, %v981_v34, %v983_v35 }
  0xac   : > { %v979_v38 = vpop.permute.xlu0 %978  ;;  %1748 = vmatmul.mubr.msk.f32.vlgmr.msra.gmra.mrb[0].mxu0 %vm195_vm2, %v1747_v36  ;;  %v657_v39 = vpop.permute.xlu1 %656 }
  0xad   : > { %833 = vmatpush1.msra.mxu0 %v823_v32  ;;  %v661_v40 = vsel %vm658_vm4, %v655_v18, %v657_v39  ;;  %896 = vmatprep.mubr.f32.mxu0 %v1965_v0  ;;  %v987_v45 = vsel %vm986_vm6, %v979_v38, %v981_v34 }
  0xae   : > { %996 = vmatprep.subr.mxu0 %v988_v37  ;;  %1803 = vmatpush3.msra.mxu1 %v661_v40 }
  0xaf   : > { %1807 = vmatprep.subr.mxu1 %v1965_v0  ;;  %1805 = vmatmul.mubr.msk.f32.vlgmr.msra.gmra.mrb[6].mxu1 %vm195_vm2, %v1747_v36 }
  0xb0   : > { %v821_v41 = vpop.permute.xlu0 %820  ;;  %v1145_v42 = vpop.permute.xlu1 %1144  ;;  %1809 = vmatprep.mubr.msk.f32.mxu1 %vm1968_vm0, %v1965_v0 }
  0xb1   : > { %v825_v43 = vsel %vm822_vm5, %v819_v26, %v821_v41 }
  0xb2   : > { %1646 = vst [vmem:[%s2118_s29 + $0x10] sm:$0xf] %v825_v43  ;;  %1808 = vmatpush3.msra.mxu1 %v825_v43 }
  0xb3   : > { %1810 = vmatmul.mubr.msk.f32.vlgmr.msra.gmra.mrb[8].mxu1 %vm195_vm2, %v1750_v44  ;;  %1812 = vmatprep.subr.mxu1 %v1965_v0 }
  0xb4   : > { %v1147_v46 = vpop.permute.xlu0 %1146  ;;  %1751 = vmatmul.mubr.msk.f32.vlgmr.msra.gmra.mrb[0].mxu0 %vm195_vm2, %v1750_v44  ;;  %v1143_v47 = vpop.permute.xlu1 %1142  ;;  %1814 = vmatprep.mubr.msk.f32.mxu1 %vm1968_vm0, %v1965_v0 }
  0xb5   : > { %997 = vmatpush1.msra.mxu0 %v987_v45  ;;  %v1152_v48 = vsel %vm1150_vm7, %v1145_v42, %v1147_v46  ;;  %1060 = vmatprep.mubr.f32.mxu0 %v1965_v0  ;;  %v1151_v54 = vsel %vm1150_vm7, %v1143_v47, %v1145_v42 }
  0xb6   : > { %1160 = vmatprep.subr.mxu0 %v1152_v48 }
  0xb8   : > { %v985_v49 = vpop.permute.xlu0 %984  ;;  %v1149_v50 = vpop.permute.xlu1 %1148 }
  0xb9   : > { %v989_v52 = vsel %vm986_vm6, %v983_v35, %v985_v49  ;;  %v1153_v53 = vsel %vm1150_vm7, %v1147_v46, %v1149_v50 }
  0xba   : > { %1813 = vmatpush3.msra.mxu1 %v989_v52 }
  0xbb   : > { %1815 = vmatmul.mubr.msk.f32.vlgmr.msra.gmra.mrb[10].mxu1 %vm195_vm2, %v1753_v51  ;;  %1817 = vmatprep.subr.mxu1 %v1965_v0 }
  0xbc   : > { %v1309_v55 = vpop.permute.xlu0 %1308  ;;  %1754 = vmatmul.mubr.msk.f32.vlgmr.msra.gmra.mrb[0].mxu0 %vm195_vm2, %v1753_v51  ;;  %1818 = vmatpush3.msra.mxu1 %v1153_v53  ;;  %v1311_v56 = vpop.permute.xlu1 %1310 }
  0xbd   : > { %1161 = vmatpush1.msra.mxu0 %v1151_v54  ;;  %1819 = vmatprep.mubr.msk.f32.mxu1 %vm1968_vm0, %v1965_v0  ;;  %v1316_v58 = vsel %vm1314_vm8, %v1309_v55, %v1311_v56 }
  0xbe   : > { %1324 = vmatprep.subr.mxu0 %v1316_v58  ;;  %1822 = vmatprep.subr.mxu1 %v1965_v0 }
  0xbf   : > { %1820 = vmatmul.mubr.msk.f32.vlgmr.msra.gmra.mrb[12].mxu1 %vm195_vm2, %v1756_v57  ;;  %1224 = vmatprep.mubr.f32.mxu0 %v1965_v0 }
  0xc0   : > { %v1307_v59 = vpop.permute.xlu0 %1306  ;;  %v1313_v60 = vpop.permute.xlu1 %1312  ;;  %1824 = vmatprep.mubr.msk.f32.mxu1 %vm1968_vm0, %v1965_v0 }
  0xc1   : > { %v1317_v62 = vsel %vm1314_vm8, %v1311_v56, %v1313_v60  ;;  %v1315_v63 = vsel %vm1314_vm8, %v1307_v59, %v1309_v55 }
  0xc2   : > { %1823 = vmatpush3.msra.mxu1 %v1317_v62 }
  0xc3   : > { %1825 = vmatmul.mubr.msk.f32.vlgmr.msra.gmra.mrb[14].mxu1 %vm195_vm2, %v1759_v61  ;;  %1827 = vmatprep.subr.mxu1 %v1965_v0 }
  0xc4   : > { %v1473_v1 = vpop.permute.xlu0 %1472  ;;  %1757 = vmatmul.mubr.msk.f32.vlgmr.msra.gmra.mrb[0].mxu0 %vm195_vm2, %v1756_v57  ;;  %v1475_v2 = vpop.permute.xlu1 %1474  ;;  %1829 = vmatprep.mubr.msk.f32.mxu1 %vm1968_vm0, %v1965_v0 }
  0xc5   : > { %1325 = vmatpush1.msra.mxu0 %v1315_v63  ;;  %v1480_v3 = vsel %vm1478_vm9, %v1473_v1, %v1475_v2  ;;  %1388 = vmatprep.mubr.f32.mxu0 %v1965_v0 }
  0xc6   : > { %1488 = vmatprep.subr.mxu0 %v1480_v3 }
  0xc8   : > { %v1477_v4 = vpop.permute.xlu0 %1476  ;;  %v1471_v5 = vpop.permute.xlu1 %1470 }
  0xc9   : > { %v1481_v7 = vsel %vm1478_vm9, %v1475_v2, %v1477_v4  ;;  %v1479_v8 = vsel %vm1478_vm9, %v1471_v5, %v1473_v1 }
  0xca   : > { %1828 = vmatpush3.msra.mxu1 %v1481_v7 }
  0xcb   : > { %1830 = vmatmul.mubr.msk.f32.vlgmr.msra.gmra.mrb[16].mxu1 %vm195_vm2, %v1762_v6 }
  0xcc   : > { %1760 = vmatmul.mubr.msk.f32.vlgmr.msra.gmra.mrb[0].mxu0 %vm195_vm2, %v1759_v61 }
  0xcd   : > { %1489 = vmatpush1.msra.mxu0 %v1479_v8  ;;  %1552 = vmatprep.mubr.f32.mxu0 %v1965_v0 }
  0xd4   : > { %1763 = vmatmul.mubr.msk.f32.vlgmr.msra.gmra.mrb[0].mxu0 %vm195_vm2, %v1762_v6 }
  0xd9   : > { %v1636_v32 = vpop.permute.xlu0 %1635 }
 0x172   : > { %v336_v9 = vpop.f32.mrb[0].mxu1 }
 0x173   : > { %v1791_v10 = vpop.f32.mrb[1].mxu1 }
 0x176   : > { %v480_v11 = vpop.f32.mrb[2].mxu1 }
 0x177   : > { %v481_v12 = vadd.f32 %v480_v11, %v336_v9  ;;  %v1796_v13 = vpop.f32.mrb[3].mxu1 }
 0x17a   : > { %v641_v14 = vpop.f32.mrb[4].mxu1 }
 0x17b   : > { %v647_v15 = vadd.f32 %v641_v14, %v481_v12  ;;  %v1801_v16 = vpop.f32.mrb[5].mxu1 }
 0x182   : > { %v805_v17 = vpop.f32.mrb[6].mxu1 }
 0x183   : > { %v811_v18 = vadd.f32 %v805_v17, %v647_v15  ;;  %v1806_v19 = vpop.f32.mrb[7].mxu1 }
 0x186   : > { %v969_v20 = vpop.f32.mrb[8].mxu1 }
 0x187   : > { %v975_v21 = vadd.f32 %v969_v20, %v811_v18  ;;  %v1811_v22 = vpop.f32.mrb[9].mxu1 }
 0x18e   : > { %v1133_v23 = vpop.f32.mrb[10].mxu1 }
 0x18f   : > { %v1139_v24 = vadd.f32 %v1133_v23, %v975_v21  ;;  %v1816_v0 = vpop.f32.mrb[11].mxu1 }
 0x192   : > { %v1297_v25 = vpop.f32.mrb[12].mxu1 }
 0x193   : > { %v1303_v26 = vadd.f32 %v1297_v25, %v1139_v24  ;;  %v1821_v27 = vpop.f32.mrb[13].mxu1 }
 0x196   : > { %v1461_v28 = vpop.f32.mrb[14].mxu1 }
 0x197   : > { %v1467_v29 = vadd.f32 %v1461_v28, %v1303_v26  ;;  %v1826_v30 = vpop.f32.mrb[15].mxu1 }
 0x19e   : > { %v1625_v31 = vpop.f32.mrb[16].mxu1 }
 0x19f   : > { %v1631_v33 = vadd.f32 %v1625_v31, %v1467_v29  ;;  %v1831_v34 = vpop.f32.mrb[17].mxu1 }
 0x1a1   : > { %v1640_v35 = vadd.f32 %v1636_v32, %v1631_v33 }
 0x1a3   : > { %v1643_v36 = vmax.f32 %v1640_v35, 0.0 }
 0x1a5   : > { %v1652_v37 = vrot.slane %v1643_v36, 4 }
 0x1a7   : > { %1658 = vst [vmem:[%s2118_s29 + $0x10] sm:$0xf0] %v1652_v37  ;;  %v1554_v38 = vpop.f32.mrb[0].mxu0 }
 0x1a8   : > { %v1638_v39 = vadd.f32 %v1636_v32, %v1554_v38  ;;  %v1556_v40 = vpop.f32.mrb[1].mxu0 }
 0x1a9   : > { %v1639_v41 = vadd.f32 %v1636_v32, %v1556_v40 }
 0x1aa   : > { %v1641_v42 = vmax.f32 %v1638_v39, 0.0 }
 0x1ab   : > { %v1642_v43 = vmax.f32 %v1639_v41, 0.0 }
 0x1ac   : > { %v1650_v44 = vrot.slane %v1641_v42, 4 }
 0x1ad   : > { %v1651_v45 = vrot.slane %v1642_v43, 4 }
 0x1ae   : > { %1656 = vst [vmem:[%s2118_s29] sm:$0xf0] %v1650_v44 }
 0x1af   : > { %1657 = vst [vmem:[%s2118_s29 + $0x8] sm:$0xf0] %v1651_v45 }
 0x1b0   : > { %1914 = shalt.err (!%p1911_p3)
}
 0x1b1   : > { %s1915_s20 = scalar_lea.hbm %s2199_s30, 384  ;;  %s1919_s9 = scalar_lea.hbm %s2248_s3, 768 }
 0x1b2   : > { %p1916_p4 = scmp.ne.s32.totalorder %s2199_s30, %s1915_s20  ;;  %p1920_p9 = scmp.lt.u32.totalorder %s2199_s30, %s2248_s3 }
 0x1b3   : > { %p1921_p10 = scmp.lt.u32.totalorder %s1919_s9, %s1915_s20  ;;  %p1923_p12 = scmp.lt.u32.totalorder %s1915_s20, %s2199_s30 }
 0x1b4   : > { %p1917_p7 = pnand %p1916_p4, %p2035_p5 }
 0x1b5   : > { %p1922_p11 = por %p1921_p10, %p1920_p9 }
 0x1b6   : > { %p1918_p8 = pneg %p1917_p7 }
 0x1b7   : > { %p1924_p13 = por %p1923_p12, %p1922_p11 }
 0x1b9   : > { %p1925_p0 = pnand %p1924_p13, %p1918_p8 }
 0x1bb   : > { %1928 = shalt.err (!%p1925_p0)
}
 0x1bc   : > { %1850 = dma.vmem_to_hbm [thread:$0]  (%p2035_p5), %s2201_s26, 384, %s2199_s30, %s1660_s4  }
 0x1bd PF: > { %p1856_p1 = scmp.ge.s32.totalorder %s1963_s15, 2  ;;  %s1686_s17 = sand.u32 1, %s1951_s12  }
 0x1be   : > { %s1687_s19 = scalar_lea.sflag [#allocation3], %s1686_s17 }
 0x1bf   : > { %p1853_p2 = pnand %p1856_p1, %p2039_p6 }
 0x1c1   : > { %1946 = dma.done.wait (!%p1853_p2), %s1687_s19, 384  }
 0x1c2   : > { %1948 = vsyncadd (!%p1853_p2), %s1687_s19, 4294966912  ;;  %p13_p3 = scmp.ge.s32.totalorder %s2022_s18, 4   ;;  %s2251_s12 = smov %s1955_s13 }
 0x1c3   : > { %s2252_s13 = smov %s1959_s14  ;;  %s2253_s14 = smov %s2033_s21 }
 0x1c4   : > { %s2254_s15 = smov %s2022_s18  ;;  %15 = sbr.rel (!%p13_p3) target bundleno = 3 (0x3), region = 75 }
 0x1cb   :  { %1692 = vsyncpa [#allocation3], 1 }
 0x1cc   :  { %1694 = vsyncpa [#allocation3 + $0x1], 1 }

</bundles_post_ra>
